<compile_context>
chip_gen: v7x
topology: tpu7x:2x2x1
jax: 0.10.0
libtpu: 0.0.40
codegen_flags: <defaults>
</compile_context>

<pallas_src>
import jax
import jax.numpy as jnp
from jax.experimental import pallas as pl
from jax.experimental.pallas import tpu as pltpu


def _svm_kernel(x_ref, w_ref, b_ref, o_ref, acc_ref):
    # x_ref: (TB, TK) VMEM   w_ref: (TK, 1) VMEM   b_ref: (1,) SMEM
    # o_ref: (TB, 1) VMEM    acc_ref: (TB, 1) f32 VMEM scratch
    k = pl.program_id(1)

    @pl.when(k == 0)
    def _():
        acc_ref[...] = jnp.zeros_like(acc_ref)

    acc_ref[...] += jnp.dot(x_ref[...], w_ref[...],
                            preferred_element_type=jnp.float32)

    @pl.when(k == pl.num_programs(1) - 1)
    def _():
        o_ref[...] = (acc_ref[...] + b_ref[0]).astype(o_ref.dtype)


def linear_svm_forward(x, weight, bias, *, max_tile_rows=1024,
                       max_tile_k=2048,
                       vmem_budget_bytes=8 * 1024 * 1024):
    """x: (B, D), weight: (D,), bias: (1,) -> (B,)  (matches x @ weight + bias)."""
    B, D = x.shape
    itemsize = x.dtype.itemsize

    # --- feature (K) tile: full D when it fits, else lane-aligned chunks ---
    tk = D if D <= max_tile_k else max_tile_k          # max_tile_k % 128 == 0
    num_k = pl.cdiv(D, tk)
    d_padded = num_k * tk

    # --- batch tile: largest double-buffered (TB, TK) x tile within budget ---
    rows_fit = max(vmem_budget_bytes // (2 * tk * itemsize), 8)
    tb = int(min(max_tile_rows, rows_fit))
    tb = max((tb // 8) * 8, 8)                         # f32 sublane multiple
    b_pad8 = ((B + 7) // 8) * 8
    tb = min(tb, b_pad8)

    num_b = pl.cdiv(B, tb)
    b_padded = num_b * tb

    # Zero-pad batch/features; padded rows/cols contribute 0 and are sliced off.
    if b_padded != B or d_padded != D:
        x = jnp.pad(x, ((0, b_padded - B), (0, d_padded - D)))
    w2d = weight.reshape(D, 1).astype(x.dtype)
    if d_padded != D:
        w2d = jnp.pad(w2d, ((0, d_padded - D), (0, 0)))
    b1d = bias.reshape(1).astype(jnp.float32)

    cost = pl.CostEstimate(
        flops=2 * B * D,
        transcendentals=0,
        bytes_accessed=itemsize * (b_padded * d_padded + d_padded + b_padded),
    )

    out = pl.pallas_call(
        _svm_kernel,
        out_shape=jax.ShapeDtypeStruct((b_padded, 1), x.dtype),
        grid_spec=pltpu.PrefetchScalarGridSpec(
            num_scalar_prefetch=0,
            grid=(num_b, num_k),                        # reduction axis last
            in_specs=[
                pl.BlockSpec((tb, tk), lambda i, k: (i, k)),        # streamed x tiles
                pl.BlockSpec((tk, 1), lambda i, k: (k, 0)),         # weight column chunk
                pl.BlockSpec(memory_space=pltpu.MemorySpace.SMEM),  # bias scalar
            ],
            out_specs=pl.BlockSpec((tb, 1), lambda i, k: (i, 0)),   # resident across k
            scratch_shapes=[pltpu.VMEM((tb, 1), jnp.float32)],
        ),
        compiler_params=pltpu.CompilerParams(
            dimension_semantics=("parallel", "arbitrary"),  # megacore on batch tiles
        ),
        cost_estimate=cost,
    )(x, w2d, b1d)

    return out[:B, 0]


if __name__ == "__main__":
    key = jax.random.PRNGKey(0)
    k_x, k_w, k_b, k_x2, k_x3, k_w3 = jax.random.split(key, 6)

    # Deterministic synthetic params (mirrors torch.randn init shapes).
    batch, input_dim = 8, 32
    x = jax.random.normal(k_x, (batch, input_dim), dtype=jnp.float32)
    weight = jax.random.normal(k_w, (input_dim,), dtype=jnp.float32)
    bias = jax.random.normal(k_b, (1,), dtype=jnp.float32)

    out = linear_svm_forward(x, weight, bias)
    jax.block_until_ready(out)
    ref = x @ weight + bias
    assert out.shape == (batch,)
    assert jnp.allclose(out, ref, atol=1e-5, rtol=1e-5)

    # Multi-tile batch + row-padding path (B not a multiple of the row tile).
    batch2 = 20
    x2 = jax.random.normal(k_x2, (batch2, input_dim), dtype=jnp.float32)
    out2 = linear_svm_forward(x2, weight, bias, max_tile_rows=8)
    jax.block_until_ready(out2)
    ref2 = x2 @ weight + bias
    assert out2.shape == (batch2,)
    assert jnp.allclose(out2, ref2, atol=1e-5, rtol=1e-5)

    # K-tiled reduction path (accumulator across feature chunks).
    batch3, input_dim3 = 16, 384
    x3 = jax.random.normal(k_x3, (batch3, input_dim3), dtype=jnp.float32)
    w3 = jax.random.normal(k_w3, (input_dim3,), dtype=jnp.float32)
    out3 = linear_svm_forward(x3, w3, bias, max_tile_k=128)
    jax.block_until_ready(out3)
    ref3 = x3 @ w3 + bias
    assert out3.shape == (batch3,)
    assert jnp.allclose(out3, ref3, atol=1e-4, rtol=1e-4)

    print("KERNEL_OK")
</pallas_src>

<mosaic_0001>
module attributes {stable_mosaic.version = 11 : i64} {
  func.func @_svm_kernel(%arg0: i32, %arg1: i32, %arg2: memref<8x32xf32, #tpu.memory_space<vmem>>, %arg3: memref<32x1xf32, #tpu.memory_space<vmem>>, %arg4: memref<1xf32, #tpu.memory_space<smem>>, %arg5: memref<8x1xf32, #tpu.memory_space<vmem>>, %arg6: memref<8x1xf32, #tpu.memory_space<vmem>>) attributes {dimension_semantics = [#tpu.dimension_semantics<parallel>, #tpu.dimension_semantics<arbitrary>], iteration_bounds = array<i64: 1, 1>, scalar_prefetch = 0 : i64, scratch_operands = 1 : i64, tpu.core_type = #tpu.core_type<tc>, window_params = [{transform_indices = @transform_0, window_bounds = array<i64: 8, 32>}, {transform_indices = @transform_1, window_bounds = array<i64: 32, 1>}, {transform_indices = @transform_2, window_bounds = array<i64: 1>}, {transform_indices = @transform_3, window_bounds = array<i64: 8, 1>}]} {
    %c0_i32 = arith.constant 0 : i32
    %0 = arith.cmpi eq, %arg1, %c0_i32 : i32
    %1 = arith.extui %0 : i1 to i32
    %c0_i32_0 = arith.constant 0 : i32
    %2 = arith.cmpi ne, %1, %c0_i32_0 : i32
    scf.if %2 {
      %cst_10 = arith.constant 0.000000e+00 : f32
      %12 = vector.broadcast %cst_10 : f32 to vector<8x1xf32>
      %c0_11 = arith.constant 0 : index
      %c0_12 = arith.constant 0 : index
      %13 = vector.load %arg6[%c0_11, %c0_12] : memref<8x1xf32, #tpu.memory_space<vmem>>, vector<8x1xf32>
      tpu.vector_store %arg6[%c0_11, %c0_12], %12 {strides = array<i32>} : memref<8x1xf32, #tpu.memory_space<vmem>>, vector<8x1xf32>,
    } else {
    }
    %c0 = arith.constant 0 : index
    %c0_1 = arith.constant 0 : index
    %3 = vector.load %arg6[%c0, %c0_1] : memref<8x1xf32, #tpu.memory_space<vmem>>, vector<8x1xf32>
    %c0_2 = arith.constant 0 : index
    %c0_3 = arith.constant 0 : index
    %4 = vector.load %arg2[%c0_2, %c0_3] : memref<8x32xf32, #tpu.memory_space<vmem>>, vector<8x32xf32>
    %c0_4 = arith.constant 0 : index
    %c0_5 = arith.constant 0 : index
    %5 = vector.load %arg3[%c0_4, %c0_5] : memref<32x1xf32, #tpu.memory_space<vmem>>, vector<32x1xf32>
    %cst = arith.constant dense<0.000000e+00> : vector<8x1xf32>
    %6 = tpu.matmul %4, %5, %cst {dimension_numbers = #tpu.dot_dimension_numbers<[1], [0], [0], [1], [0, 0, 1, 1], [], []>} : vector<8x32xf32>, vector<32x1xf32>, vector<8x1xf32> -> vector<8x1xf32>
    %7 = arith.addf %3, %6 : vector<8x1xf32>
    %c0_6 = arith.constant 0 : index
    %c0_7 = arith.constant 0 : index
    %8 = vector.load %arg6[%c0_6, %c0_7] : memref<8x1xf32, #tpu.memory_space<vmem>>, vector<8x1xf32>
    tpu.vector_store %arg6[%c0_6, %c0_7], %7 {strides = array<i32>} : memref<8x1xf32, #tpu.memory_space<vmem>>, vector<8x1xf32>,
    %c0_i32_8 = arith.constant 0 : i32
    %9 = arith.cmpi eq, %arg1, %c0_i32_8 : i32
    %10 = arith.extui %9 : i1 to i32
    %c0_i32_9 = arith.constant 0 : i32
    %11 = arith.cmpi ne, %10, %c0_i32_9 : i32
    scf.if %11 {
      %c0_10 = arith.constant 0 : index
      %c0_11 = arith.constant 0 : index
      %12 = vector.load %arg6[%c0_10, %c0_11] : memref<8x1xf32, #tpu.memory_space<vmem>>, vector<8x1xf32>
      %c0_12 = arith.constant 0 : index
      %13 = memref.load %arg4[%c0_12] : memref<1xf32, #tpu.memory_space<smem>>
      %14 = vector.broadcast %13 : f32 to vector<8x1xf32>
      %15 = arith.addf %12, %14 : vector<8x1xf32>
      %c0_13 = arith.constant 0 : index
      %c0_14 = arith.constant 0 : index
      %16 = vector.load %arg5[%c0_13, %c0_14] : memref<8x1xf32, #tpu.memory_space<vmem>>, vector<8x1xf32>
      tpu.vector_store %arg5[%c0_13, %c0_14], %15 {strides = array<i32>} : memref<8x1xf32, #tpu.memory_space<vmem>>, vector<8x1xf32>,
    } else {
    }
    return
  }
  func.func @transform_0(%arg0: i32, %arg1: i32) -> (i32, i32) {
    %c0_i32 = arith.constant 0 : i32
    return %arg0, %arg1 : i32, i32
  }
  func.func @transform_1(%arg0: i32, %arg1: i32) -> (i32, i32) {
    %c0_i32 = arith.constant 0 : i32
    %c0_i32_0 = arith.constant 0 : i32
    return %arg1, %c0_i32 : i32, i32
  }
  func.func @transform_2(%arg0: i32, %arg1: i32) -> i32 {
    %c0_i32 = arith.constant 0 : i32
    %c0_i32_0 = arith.constant 0 : i32
    return %c0_i32 : i32
  }
  func.func @transform_3(%arg0: i32, %arg1: i32) -> (i32, i32) {
    %c0_i32 = arith.constant 0 : i32
    %c0_i32_0 = arith.constant 0 : i32
    return %arg0, %c0_i32 : i32, i32
  }
}

</mosaic_0001>

<bundles_post_ra>
// kernel: tpu_custom_call.1
= control target key start
LH: loop header
LB: loop body
LE: loop exit
PB: predicated region body
PF: predicated region fallthrough
CT: control target
= control target key end

     0   :  { %vm19_vm0 = vcmask 7168   ;;  %v142_v0 = vmov 0.0|0.0   ;;  %v143_v4 = vmov 0.0   ;;  %vm144_vm1 = vmmov 0   ;;  %s189_s1 = inlined_call_operand.vmem [shape: f32[32,1], index: 1, kind: input, shape index: {}]   ;;  %s190_s0 = inlined_call_operand.vmem [shape: f32[8,32], index: 0, kind: input, shape index: {}]   ;;  %s191_s2 = inlined_call_operand.<no memory space> [shape: f32[1], index: 2, kind: input, shape index: {}]   ;;  %s192_s3 = inlined_call_operand.vmem [shape: f32[8,1], index: 3, kind: output, shape index: {}]  }
   0x1   :  { %133 = vmatprep.subr.bf16.mxu0 %v142_v0  ;;  %v23_v1 = vld [vmem:[%s189_s1] sm:$0xff]  ;;  %v24_v2 = vld [vmem:[%s189_s1 + $0x8] sm:$0xff]  ;;  %v25_v3 = vld [vmem:[%s189_s1 + $0x10] sm:$0xff]  ;;  %20 = vst.msk [vmem:[#allocation2] sm:$0xff] %vm19_vm0, %v143_v4  ;;  %130 = vmatprep.mubr.msk.f32.mxu0 %vm144_vm1, %v143_v4  ;;  %vm27_vm2 = vcmask 261120   ;;  %v109_v13 = vstv %s191_s2 }
   0x2   :  { %v134_v5 = vpack.c.bf16 %v24_v2, %v23_v1  ;;  %v26_v6 = vld [vmem:[%s189_s1 + $0x18] sm:$0xff]  ;;  %v22_v8 = vld [vmem:[%s190_s0] sm:$0xff] }
   0x3   :  { %v137_v7 = vpack.c.bf16 %v26_v6, %v25_v3 }
   0x4   :  { %135 = vmatpush3.bf16.msra.mxu0 %v134_v5 }
   0x5   :  { %136 = vmatprep.subr.bf16.mxu0 %v142_v0 }
   0x8   :  { %138 = vmatpush3.bf16.msra.mxu0 %v137_v7  ;;  %v21_v9 = vld [vmem:[#allocation2] sm:$0xff] }
   0xb   :  { %131 = vmatmul.mubr.msk.f32.vlgmr.msra.gmra.mrb[0].mxu0 %vm27_vm2, %v22_v8 }
  0xde   :  { %v97_v10 = vpop.f32.mrb[0].mxu0 }
  0xdf   :  { %v101_v11 = vadd.f32 %v97_v10, %v21_v9  ;;  %v132_v12 = vpop.f32.mrb[1].mxu0 }
  0xe1   :  { %103 = vst.msk [vmem:[#allocation2] sm:$0xff] %vm19_vm0, %v101_v11 }
  0xe8   :  { %v107_v14 = vld [vmem:[#allocation2] sm:$0xff] }
  0xe9   :  { %v110_v15 = vadd.f32 %v109_v13, %v107_v14 }
  0xeb   :  { %111 = vst.msk [vmem:[%s192_s3] sm:$0xff] %vm19_vm0, %v110_v15 }

</bundles_post_ra>
